<compile_context>
chip_gen: v5e
topology: v5e:2x2
jax: 0.10.0
libtpu: 0.0.40
codegen_flags: <defaults>
</compile_context>

<pallas_src>
import jax
import jax.numpy as jnp
from jax import lax
from jax.experimental import pallas as pl
from jax.experimental.pallas import tpu as pltpu

# ---- "Constants" from the PyTorch module (small, self-consistent) ----
NUM_EMBED = 32          # Constants.NUMBER_OF_EMBEDDING_DIMENSIONS
BLOCK_SIZE = 8          # Constants.BLOCK_SIZE (max sequence length T)
NUM_HEADS = 4
HEAD_SIZE = NUM_EMBED // NUM_HEADS   # 8; concat of heads == embedding dim
DROPOUT = 0.0           # dropout is identity at eval / p=0  # TODO(synk): training-mode dropout not implemented

# splash-attention-style dot_general dimension numbers (2-D operands)
TN_DIMS = (((0,), (0,)), ((), ()))   # lhs transposed:  A^T @ B
NT_DIMS = (((1,), (1,)), ((), ()))   # rhs transposed:  A @ B^T


def mha_kernel(xt_ref, wqkv_ref, wp3_ref, bp_ref, o_ref):
    """One grid step == one batch element (batch axis is a 'parallel' grid dim).

    xt_ref   : (C, T)      activations, pre-transposed in the wrapper
    wqkv_ref : (3*C, C)    fused [Wq; Wk; Wv], output-feature-major rows (head-major)
    wp3_ref  : (H, hs, C)  output projection Wp^T split into per-head (hs, C) row blocks
    bp_ref   : (1, C)      projection bias
    o_ref    : (T, C)      output for this batch element
    """
    C, T = xt_ref.shape
    H, hs, _ = wp3_ref.shape
    scale = C ** (-0.5)     # NOTE: PyTorch module scales by embed dim C, not head_size

    # Fused QKV projection in TRANSPOSED layout: (3C, C) @ (C, T) -> (3C, T).
    # Features live on the sublane axis, so every per-head q/k/v slice below is an
    # aligned 8-row sublane slice (free for f32) — no 8-lane-wide lane relayouts.
    qkv_t = jnp.dot(wqkv_ref[...], xt_ref[...], preferred_element_type=jnp.float32)

    # Causal mask: built ONCE, additive form (0 / -1e30), shared by every head.
    row = lax.broadcasted_iota(jnp.int32, (T, T), 0)
    col = lax.broadcasted_iota(jnp.int32, (T, T), 1)
    mask_add = jnp.where(row >= col, jnp.float32(0.0), jnp.float32(-1e30))[None]   # (1, T, T)

    # Per-head scores via 2-D TN matmuls on aligned sublane slices, stacked so the
    # scale, mask add and softmax bookkeeping run once over all heads.
    s = jnp.stack(
        [lax.dot_general(qkv_t[h * hs:(h + 1) * hs, :],              # q_t  (hs, T)
                         qkv_t[C + h * hs:C + (h + 1) * hs, :],      # k_t  (hs, T)
                         TN_DIMS, preferred_element_type=jnp.float32)  # (T, T)
         for h in range(H)], axis=0)                                  # (H, T, T)
    s = s * scale + mask_add
    s = s - jnp.max(s, axis=-1, keepdims=True)
    p = jnp.exp(s)
    denom = jnp.sum(p, axis=-1, keepdims=True)
    inv = pl.reciprocal(denom, approx=True)      # EUP slot, off the VPU path
    inv = inv * (2.0 - denom * inv)              # one Newton step -> ~f32 accuracy
    p = p * inv
    # dropout on attention weights: identity (eval / p=0)

    # Attention output + output projection accumulated per head (no lane-axis concat).
    # Bias is folded into the h=0 term; no zero-init accumulator and no separate bias add.
    pv0 = lax.dot_general(p[0], qkv_t[2 * C:2 * C + hs, :], NT_DIMS,
                          preferred_element_type=jnp.float32)          # (T, hs)
    acc = jnp.dot(pv0, wp3_ref[0], preferred_element_type=jnp.float32) + bp_ref[...]
    for h in range(1, H):
        pv = lax.dot_general(p[h], qkv_t[2 * C + h * hs:2 * C + (h + 1) * hs, :],
                             NT_DIMS, preferred_element_type=jnp.float32)
        acc = acc + jnp.dot(pv, wp3_ref[h], preferred_element_type=jnp.float32)
    # dropout on projection output: identity (eval / p=0)
    # NOTE: output last dim C=32 < 128 -> masked partial stores; noise at this size,
    # but keep the output lane dim a multiple of 128 if C ever scales.
    o_ref[...] = acc.astype(o_ref.dtype)


def multi_head_attention(x, wq, wk, wv, wp, bp):
    """x: (B, T, C); wq/wk/wv: (H, C, hs) (W^T per head, i.e. q_h = x @ wq[h]);
       wp: (C, C) torch layout (out, in); bp: (C,)."""
    B, T, C = x.shape
    H, _, hs = wq.shape

    # Wrapper-side layout plumbing (XLA ops outside the hot kernel):
    #  - x transposed to (B, C, T) so the kernel's QKV matmul is plain NN form
    #  - fused QKV weight, rows = [q heads | k heads | v heads], head-major
    #  - projection Wp^T reshaped into per-head (hs, C) row blocks (sublane-aligned)
    xt = x.transpose(0, 2, 1)                                # (B, C, T)
    wqkv_t = jnp.concatenate([
        wq.transpose(0, 2, 1).reshape(H * hs, C),
        wk.transpose(0, 2, 1).reshape(H * hs, C),
        wv.transpose(0, 2, 1).reshape(H * hs, C),
    ], axis=0)                                               # (3C, C)
    wp3 = wp.T.reshape(H, hs, C)                             # (H, hs, C)
    bp2 = bp.reshape(1, C)

    # Batch axis on the grid, marked "parallel": steps are independent so v7x megacore
    # shards them across both TensorCores; weight blocks have constant index maps and
    # are not re-fetched between steps. Working set is a few KiB, far under every
    # generation's VMEM budget (re-derive block sizes against 64 MiB if dims scale on v7x).
    return pl.pallas_call(
        mha_kernel,
        out_shape=jax.ShapeDtypeStruct((B, T, C), x.dtype),
        grid=(B,),
        in_specs=[
            pl.BlockSpec((None, C, T), lambda b: (b, 0, 0)),     # activations (batch squeezed)
            pl.BlockSpec((3 * C, C), lambda b: (0, 0)),          # fused QKV weight
            pl.BlockSpec((H, hs, C), lambda b: (0, 0, 0)),       # projection weight blocks
            pl.BlockSpec((1, C), lambda b: (0, 0)),              # projection bias
        ],
        out_specs=pl.BlockSpec((None, T, C), lambda b: (b, 0, 0)),
        compiler_params=pltpu.CompilerParams(dimension_semantics=("parallel",)),
    )(xt, wqkv_t, wp3, bp2)


def reference_mha(x, wq, wk, wv, wp, bp):
    """Pure-JAX reference matching the PyTorch forward (eval mode)."""
    B, T, C = x.shape
    mask = jnp.tril(jnp.ones((T, T), bool))
    outs = []
    for h in range(wq.shape[0]):
        q = x @ wq[h]
        k = x @ wk[h]
        v = x @ wv[h]
        w = (q @ jnp.swapaxes(k, -2, -1)) * C ** (-0.5)
        w = jnp.where(mask, w, -jnp.inf)
        w = jax.nn.softmax(w, axis=-1)
        outs.append(w @ v)
    cat = jnp.concatenate(outs, axis=-1)
    return cat @ wp.T + bp


if __name__ == "__main__":
    B, T, C, H, hs = 2, BLOCK_SIZE, NUM_EMBED, NUM_HEADS, HEAD_SIZE

    key = jax.random.PRNGKey(0)
    kx, kq, kk, kv, kp, kb = jax.random.split(key, 6)

    x = jax.random.normal(kx, (B, T, C), dtype=jnp.float32)
    # deterministic parameter init (Linear(C, hs, bias=False) per head; stored as (H, C, hs) = W^T)
    init_scale = (1.0 / C) ** 0.5
    wq = jax.random.uniform(kq, (H, C, hs), jnp.float32, -init_scale, init_scale)
    wk = jax.random.uniform(kk, (H, C, hs), jnp.float32, -init_scale, init_scale)
    wv = jax.random.uniform(kv, (H, C, hs), jnp.float32, -init_scale, init_scale)
    # projection Linear(C, C) with bias, torch weight layout (out, in)
    wp = jax.random.uniform(kp, (C, C), jnp.float32, -init_scale, init_scale)
    bp = jax.random.uniform(kb, (C,), jnp.float32, -init_scale, init_scale)

    out = multi_head_attention(x, wq, wk, wv, wp, bp)
    out = jax.block_until_ready(out)

    ref = reference_mha(x, wq, wk, wv, wp, bp)
    assert out.shape == (B, T, C)
    assert jnp.allclose(out, ref, atol=1e-5, rtol=1e-5), "mismatch vs reference"

    print("KERNEL_OK")
</pallas_src>

<mosaic_0001>
module attributes {stable_mosaic.version = 11 : i64} {
  func.func @mha_kernel(%arg0: i32, %arg1: memref<1x32x8xf32, #tpu.memory_space<vmem>>, %arg2: memref<96x32xf32, #tpu.memory_space<vmem>>, %arg3: memref<4x8x32xf32, #tpu.memory_space<vmem>>, %arg4: memref<1x32xf32, #tpu.memory_space<vmem>>, %arg5: memref<1x8x32xf32, #tpu.memory_space<vmem>>) attributes {dimension_semantics = [#tpu.dimension_semantics<parallel>], iteration_bounds = array<i64: 2>, scalar_prefetch = 0 : i64, scratch_operands = 0 : i64, tpu.core_type = #tpu.core_type<tc>, window_params = [{transform_indices = @transform_0, window_bounds = array<i64: 1, 32, 8>}, {pipeline_mode = #tpu.pipeline_mode<synchronous>, transform_indices = @transform_1, window_bounds = array<i64: 96, 32>}, {pipeline_mode = #tpu.pipeline_mode<synchronous>, transform_indices = @transform_2, window_bounds = array<i64: 4, 8, 32>}, {pipeline_mode = #tpu.pipeline_mode<synchronous>, transform_indices = @transform_3, window_bounds = array<i64: 1, 32>}, {transform_indices = @transform_4, window_bounds = array<i64: 1, 8, 32>}]} {
    %c0 = arith.constant 0 : index
    %c0_0 = arith.constant 0 : index
    %0 = vector.load %arg2[%c0, %c0_0] : memref<96x32xf32, #tpu.memory_space<vmem>>, vector<96x32xf32>
    %c0_1 = arith.constant 0 : index
    %c0_2 = arith.constant 0 : index
    %c0_3 = arith.constant 0 : index
    %1 = vector.load %arg1[%c0_1, %c0_2, %c0_3] : memref<1x32x8xf32, #tpu.memory_space<vmem>>, vector<1x32x8xf32>
    %2 = vector.shape_cast %1 : vector<1x32x8xf32> to vector<32x8xf32>
    %cst = arith.constant dense<0.000000e+00> : vector<96x8xf32>
    %3 = tpu.matmul %0, %2, %cst {dimension_numbers = #tpu.dot_dimension_numbers<[1], [0], [0], [1], [0, 0, 1, 1], [], []>} : vector<96x32xf32>, vector<32x8xf32>, vector<96x8xf32> -> vector<96x8xf32>
    %4 = tpu.iota {dimensions = array<i32: 0>} : vector<8x8xi32>
    %5 = tpu.iota {dimensions = array<i32: 1>} : vector<8x8xi32>
    %6 = arith.cmpi sge, %4, %5 : vector<8x8xi32>
    %cst_4 = arith.constant 0.000000e+00 : f32
    %cst_5 = arith.constant -1.000000e+30 : f32
    %7 = vector.broadcast %cst_4 : f32 to vector<8x8xf32>
    %8 = vector.broadcast %cst_5 : f32 to vector<8x8xf32>
    %9 = arith.select %6, %7, %8 : vector<8x8xi1>, vector<8x8xf32>
    %10 = vector.shape_cast %9 : vector<8x8xf32> to vector<1x8x8xf32>
    %11 = vector.extract_strided_slice %3 {offsets = [0, 0], sizes = [8, 8], strides = [1, 1]} : vector<96x8xf32> to vector<8x8xf32>
    %12 = vector.extract_strided_slice %3 {offsets = [32, 0], sizes = [8, 8], strides = [1, 1]} : vector<96x8xf32> to vector<8x8xf32>
    %cst_6 = arith.constant dense<0.000000e+00> : vector<8x8xf32>
    %13 = tpu.matmul %11, %12, %cst_6 {dimension_numbers = #tpu.dot_dimension_numbers<[0], [0], [1], [1], [0, 1, 1, 1], [], []>} : vector<8x8xf32>, vector<8x8xf32>, vector<8x8xf32> -> vector<8x8xf32>
    %14 = vector.extract_strided_slice %3 {offsets = [8, 0], sizes = [8, 8], strides = [1, 1]} : vector<96x8xf32> to vector<8x8xf32>
    %15 = vector.extract_strided_slice %3 {offsets = [40, 0], sizes = [8, 8], strides = [1, 1]} : vector<96x8xf32> to vector<8x8xf32>
    %cst_7 = arith.constant dense<0.000000e+00> : vector<8x8xf32>
    %16 = tpu.matmul %14, %15, %cst_7 {dimension_numbers = #tpu.dot_dimension_numbers<[0], [0], [1], [1], [0, 1, 1, 1], [], []>} : vector<8x8xf32>, vector<8x8xf32>, vector<8x8xf32> -> vector<8x8xf32>
    %17 = vector.extract_strided_slice %3 {offsets = [16, 0], sizes = [8, 8], strides = [1, 1]} : vector<96x8xf32> to vector<8x8xf32>
    %18 = vector.extract_strided_slice %3 {offsets = [48, 0], sizes = [8, 8], strides = [1, 1]} : vector<96x8xf32> to vector<8x8xf32>
    %cst_8 = arith.constant dense<0.000000e+00> : vector<8x8xf32>
    %19 = tpu.matmul %17, %18, %cst_8 {dimension_numbers = #tpu.dot_dimension_numbers<[0], [0], [1], [1], [0, 1, 1, 1], [], []>} : vector<8x8xf32>, vector<8x8xf32>, vector<8x8xf32> -> vector<8x8xf32>
    %20 = vector.extract_strided_slice %3 {offsets = [24, 0], sizes = [8, 8], strides = [1, 1]} : vector<96x8xf32> to vector<8x8xf32>
    %21 = vector.extract_strided_slice %3 {offsets = [56, 0], sizes = [8, 8], strides = [1, 1]} : vector<96x8xf32> to vector<8x8xf32>
    %cst_9 = arith.constant dense<0.000000e+00> : vector<8x8xf32>
    %22 = tpu.matmul %20, %21, %cst_9 {dimension_numbers = #tpu.dot_dimension_numbers<[0], [0], [1], [1], [0, 1, 1, 1], [], []>} : vector<8x8xf32>, vector<8x8xf32>, vector<8x8xf32> -> vector<8x8xf32>
    %23 = vector.shape_cast %13 : vector<8x8xf32> to vector<1x8x8xf32>
    %24 = vector.shape_cast %16 : vector<8x8xf32> to vector<1x8x8xf32>
    %25 = vector.shape_cast %19 : vector<8x8xf32> to vector<1x8x8xf32>
    %26 = vector.shape_cast %22 : vector<8x8xf32> to vector<1x8x8xf32>
    %27 = tpu.concatenate %23, %24, %25, %26 in 0 : vector<1x8x8xf32>, vector<1x8x8xf32>, vector<1x8x8xf32>, vector<1x8x8xf32> -> vector<4x8x8xf32>
    %cst_10 = arith.constant 0.176776692 : f32
    %28 = vector.broadcast %cst_10 : f32 to vector<4x8x8xf32>
    %29 = arith.mulf %27, %28 : vector<4x8x8xf32>
    %30 = vector.broadcast %10 : vector<1x8x8xf32> to vector<4x8x8xf32>
    %31 = arith.addf %29, %30 : vector<4x8x8xf32>
    %cst_11 = arith.constant dense<0xFF800000> : vector<4x8xf32>
    %32 = vector.multi_reduction <maximumf>, %31, %cst_11 [2] : vector<4x8x8xf32> to vector<4x8xf32>
    %33 = vector.shape_cast %32 : vector<4x8xf32> to vector<4x8x1xf32>
    %34 = vector.broadcast %33 : vector<4x8x1xf32> to vector<4x8x8xf32>
    %35 = arith.subf %31, %34 : vector<4x8x8xf32>
    %36 = math.exp %35 : vector<4x8x8xf32>
    %cst_12 = arith.constant dense<0.000000e+00> : vector<4x8xf32>
    %37 = vector.multi_reduction <add>, %36, %cst_12 [2] : vector<4x8x8xf32> to vector<4x8xf32>
    %38 = vector.shape_cast %37 : vector<4x8xf32> to vector<4x8x1xf32>
    %39 = tpu.reciprocal %38 {approx = true} : vector<4x8x1xf32> -> vector<4x8x1xf32>
    %40 = arith.mulf %38, %39 : vector<4x8x1xf32>
    %cst_13 = arith.constant 2.000000e+00 : f32
    %41 = vector.broadcast %cst_13 : f32 to vector<4x8x1xf32>
    %42 = arith.subf %41, %40 : vector<4x8x1xf32>
    %43 = arith.mulf %39, %42 : vector<4x8x1xf32>
    %44 = vector.broadcast %43 : vector<4x8x1xf32> to vector<4x8x8xf32>
    %45 = arith.mulf %36, %44 : vector<4x8x8xf32>
    %46 = vector.extract_strided_slice %45 {offsets = [0, 0, 0], sizes = [1, 8, 8], strides = [1, 1, 1]} : vector<4x8x8xf32> to vector<1x8x8xf32>
    %47 = vector.shape_cast %46 : vector<1x8x8xf32> to vector<8x8xf32>
    %48 = vector.extract_strided_slice %3 {offsets = [64, 0], sizes = [8, 8], strides = [1, 1]} : vector<96x8xf32> to vector<8x8xf32>
    %cst_14 = arith.constant dense<0.000000e+00> : vector<8x8xf32>
    %49 = tpu.matmul %47, %48, %cst_14 {dimension_numbers = #tpu.dot_dimension_numbers<[1], [1], [0], [0], [0, 0, 1, 0], [], []>} : vector<8x8xf32>, vector<8x8xf32>, vector<8x8xf32> -> vector<8x8xf32>
    %c0_15 = arith.constant 0 : index
    %c0_16 = arith.constant 0 : index
    %c0_17 = arith.constant 0 : index
    %50 = vector.load %arg3[%c0_15, %c0_16, %c0_17] : memref<4x8x32xf32, #tpu.memory_space<vmem>>, vector<1x8x32xf32>
    %51 = vector.shape_cast %50 : vector<1x8x32xf32> to vector<8x32xf32>
    %cst_18 = arith.constant dense<0.000000e+00> : vector<8x32xf32>
    %52 = tpu.matmul %49, %51, %cst_18 {dimension_numbers = #tpu.dot_dimension_numbers<[1], [0], [0], [1], [0, 0, 1, 1], [], []>} : vector<8x8xf32>, vector<8x32xf32>, vector<8x32xf32> -> vector<8x32xf32>
    %c0_19 = arith.constant 0 : index
    %c0_20 = arith.constant 0 : index
    %53 = vector.load %arg4[%c0_19, %c0_20] : memref<1x32xf32, #tpu.memory_space<vmem>>, vector<1x32xf32>
    %54 = vector.broadcast %53 : vector<1x32xf32> to vector<8x32xf32>
    %55 = arith.addf %52, %54 : vector<8x32xf32>
    %56 = vector.extract_strided_slice %45 {offsets = [1, 0, 0], sizes = [1, 8, 8], strides = [1, 1, 1]} : vector<4x8x8xf32> to vector<1x8x8xf32>
    %57 = vector.shape_cast %56 : vector<1x8x8xf32> to vector<8x8xf32>
    %58 = vector.extract_strided_slice %3 {offsets = [72, 0], sizes = [8, 8], strides = [1, 1]} : vector<96x8xf32> to vector<8x8xf32>
    %cst_21 = arith.constant dense<0.000000e+00> : vector<8x8xf32>
    %59 = tpu.matmul %57, %58, %cst_21 {dimension_numbers = #tpu.dot_dimension_numbers<[1], [1], [0], [0], [0, 0, 1, 0], [], []>} : vector<8x8xf32>, vector<8x8xf32>, vector<8x8xf32> -> vector<8x8xf32>
    %c1 = arith.constant 1 : index
    %c0_22 = arith.constant 0 : index
    %c0_23 = arith.constant 0 : index
    %60 = vector.load %arg3[%c1, %c0_22, %c0_23] : memref<4x8x32xf32, #tpu.memory_space<vmem>>, vector<1x8x32xf32>
    %61 = vector.shape_cast %60 : vector<1x8x32xf32> to vector<8x32xf32>
    %cst_24 = arith.constant dense<0.000000e+00> : vector<8x32xf32>
    %62 = tpu.matmul %59, %61, %cst_24 {dimension_numbers = #tpu.dot_dimension_numbers<[1], [0], [0], [1], [0, 0, 1, 1], [], []>} : vector<8x8xf32>, vector<8x32xf32>, vector<8x32xf32> -> vector<8x32xf32>
    %63 = arith.addf %55, %62 : vector<8x32xf32>
    %64 = vector.extract_strided_slice %45 {offsets = [2, 0, 0], sizes = [1, 8, 8], strides = [1, 1, 1]} : vector<4x8x8xf32> to vector<1x8x8xf32>
    %65 = vector.shape_cast %64 : vector<1x8x8xf32> to vector<8x8xf32>
    %66 = vector.extract_strided_slice %3 {offsets = [80, 0], sizes = [8, 8], strides = [1, 1]} : vector<96x8xf32> to vector<8x8xf32>
    %cst_25 = arith.constant dense<0.000000e+00> : vector<8x8xf32>
    %67 = tpu.matmul %65, %66, %cst_25 {dimension_numbers = #tpu.dot_dimension_numbers<[1], [1], [0], [0], [0, 0, 1, 0], [], []>} : vector<8x8xf32>, vector<8x8xf32>, vector<8x8xf32> -> vector<8x8xf32>
    %c2 = arith.constant 2 : index
    %c0_26 = arith.constant 0 : index
    %c0_27 = arith.constant 0 : index
    %68 = vector.load %arg3[%c2, %c0_26, %c0_27] : memref<4x8x32xf32, #tpu.memory_space<vmem>>, vector<1x8x32xf32>
    %69 = vector.shape_cast %68 : vector<1x8x32xf32> to vector<8x32xf32>
    %cst_28 = arith.constant dense<0.000000e+00> : vector<8x32xf32>
    %70 = tpu.matmul %67, %69, %cst_28 {dimension_numbers = #tpu.dot_dimension_numbers<[1], [0], [0], [1], [0, 0, 1, 1], [], []>} : vector<8x8xf32>, vector<8x32xf32>, vector<8x32xf32> -> vector<8x32xf32>
    %71 = arith.addf %63, %70 : vector<8x32xf32>
    %72 = vector.extract_strided_slice %45 {offsets = [3, 0, 0], sizes = [1, 8, 8], strides = [1, 1, 1]} : vector<4x8x8xf32> to vector<1x8x8xf32>
    %73 = vector.shape_cast %72 : vector<1x8x8xf32> to vector<8x8xf32>
    %74 = vector.extract_strided_slice %3 {offsets = [88, 0], sizes = [8, 8], strides = [1, 1]} : vector<96x8xf32> to vector<8x8xf32>
    %cst_29 = arith.constant dense<0.000000e+00> : vector<8x8xf32>
    %75 = tpu.matmul %73, %74, %cst_29 {dimension_numbers = #tpu.dot_dimension_numbers<[1], [1], [0], [0], [0, 0, 1, 0], [], []>} : vector<8x8xf32>, vector<8x8xf32>, vector<8x8xf32> -> vector<8x8xf32>
    %c3 = arith.constant 3 : index
    %c0_30 = arith.constant 0 : index
    %c0_31 = arith.constant 0 : index
    %76 = vector.load %arg3[%c3, %c0_30, %c0_31] : memref<4x8x32xf32, #tpu.memory_space<vmem>>, vector<1x8x32xf32>
    %77 = vector.shape_cast %76 : vector<1x8x32xf32> to vector<8x32xf32>
    %cst_32 = arith.constant dense<0.000000e+00> : vector<8x32xf32>
    %78 = tpu.matmul %75, %77, %cst_32 {dimension_numbers = #tpu.dot_dimension_numbers<[1], [0], [0], [1], [0, 0, 1, 1], [], []>} : vector<8x8xf32>, vector<8x32xf32>, vector<8x32xf32> -> vector<8x32xf32>
    %79 = arith.addf %71, %78 : vector<8x32xf32>
    %c0_33 = arith.constant 0 : index
    %c0_34 = arith.constant 0 : index
    %c0_35 = arith.constant 0 : index
    %80 = vector.load %arg5[%c0_33, %c0_34, %c0_35] : memref<1x8x32xf32, #tpu.memory_space<vmem>>, vector<1x8x32xf32>
    %81 = vector.shape_cast %80 : vector<1x8x32xf32> to vector<8x32xf32>
    %82 = vector.shape_cast %79 : vector<8x32xf32> to vector<1x8x32xf32>
    tpu.vector_store %arg5[%c0_33, %c0_34, %c0_35], %82 {strides = array<i32>} : memref<1x8x32xf32, #tpu.memory_space<vmem>>, vector<1x8x32xf32>,
    return
  }
  func.func @transform_0(%arg0: i32) -> (i32, i32, i32) {
    %c0_i32 = arith.constant 0 : i32
    %c0_i32_0 = arith.constant 0 : i32
    %c0_i32_1 = arith.constant 0 : i32
    return %arg0, %c0_i32, %c0_i32_0 : i32, i32, i32
  }
  func.func @transform_1(%arg0: i32) -> (i32, i32) {
    %c0_i32 = arith.constant 0 : i32
    %c0_i32_0 = arith.constant 0 : i32
    %c0_i32_1 = arith.constant 0 : i32
    return %c0_i32, %c0_i32_0 : i32, i32
  }
  func.func @transform_2(%arg0: i32) -> (i32, i32, i32) {
    %c0_i32 = arith.constant 0 : i32
    %c0_i32_0 = arith.constant 0 : i32
    %c0_i32_1 = arith.constant 0 : i32
    %c0_i32_2 = arith.constant 0 : i32
    return %c0_i32, %c0_i32_0, %c0_i32_1 : i32, i32, i32
  }
  func.func @transform_3(%arg0: i32) -> (i32, i32) {
    %c0_i32 = arith.constant 0 : i32
    %c0_i32_0 = arith.constant 0 : i32
    %c0_i32_1 = arith.constant 0 : i32
    return %c0_i32, %c0_i32_0 : i32, i32
  }
  func.func @transform_4(%arg0: i32) -> (i32, i32, i32) {
    %c0_i32 = arith.constant 0 : i32
    %c0_i32_0 = arith.constant 0 : i32
    %c0_i32_1 = arith.constant 0 : i32
    return %arg0, %c0_i32, %c0_i32_0 : i32, i32, i32
  }
}

</mosaic_0001>

<bundles_post_ra>
// kernel: tpu_custom_call.1
= control target key start
LH: loop header
LB: loop body
LE: loop exit
PB: predicated region body
PF: predicated region fallthrough
CT: control target
= control target key end

     0   :  { %9 = vsyncpa [#allocation3], 0  ;;  %s1255_s0 = inlined_call_operand.vmem [shape: f32[2,32,8], index: 0, kind: input, shape index: {}]   ;;  %s1256_s1 = inlined_call_operand.vmem [shape: f32[96,32], index: 1, kind: input, shape index: {}]   ;;  %s1257_s2 = inlined_call_operand.vmem [shape: f32[4,8,32], index: 2, kind: input, shape index: {}]   ;;  %s1258_s3 = inlined_call_operand.vmem [shape: f32[1,32], index: 3, kind: input, shape index: {}]   ;;  %s1259_s4 = inlined_call_operand.hbm [shape: f32[2,8,32], index: 4, kind: output, shape index: {}]  }
   0x1   :  { %11 = vsyncpa [#allocation3 + $0x1], 0  ;;  %s1082_s15 = smov 0   ;;  %s1084_s16 = smov 0  }
   0x2   :  { %s1086_s17 = smov 0   ;;  %s1088_s18 = smov 0  }
   0x3 LB: > { %s1103_s19 = sadd.s32 4294967295, %s1054_s18   ;;  %s879_s20 = sadd.s32 4294967294, %s1054_s18   ;;  %s1054_s18 = sphi %s1088_s18, %s1265_s18   ;;  %s1050_s17 = sphi %s1086_s17, %s1264_s17   ;;  %s1046_s16 = sphi %s1084_s16, %s1263_s16   ;;  %s1042_s15 = sphi %s1082_s15, %s1262_s15  }
   0x4   : > { %s1107_s21 = sadd.s32 1, %s1054_s18   ;;  %s113_s22 = sadd.s32 1, %s1050_s17 }
   0x5   : > { %s110_s23 = ssub.s32 %s1054_s18, %s1107_s21  ;;  %p123_p0 = scmp.ne.s32.totalorder %s1050_s17, %s1046_s16 }
   0x6   : > { %p111_p1 = scmp.eq.s32.totalorder %s110_s23, 0  ;;  %p124_p2 = scmp.eq.s32.totalorder %s1103_s19, 1 }
   0x7   : > { %p129_p3 = scmp.ne.s32.totalorder %s1046_s16, %s1042_s15  ;;  %p130_p4 = scmp.eq.s32.totalorder %s879_s20, 1 }
   0x8   : > { %s1118_s24 = scalar_select %p111_p1, %s1050_s17, %s113_s22  }
   0x9   : > { %p1120_p5 = por %p124_p2, %p123_p0  ;;  %p1124_p6 = por %p130_p4, %p129_p3 }
   0xa   : > { %p882_p7 = scmp.ge.s32.totalorder %s1054_s18, 1  ;;  %p165_p8 = scmp.lt.s32.totalorder %s1054_s18, 3 }
   0xc   : > { %p166_p9 = pnand %p882_p7, %p165_p8 }
   0xd   : > { %p191_p10 = scmp.lt.s32.totalorder (!%p166_p9), %s1103_s19, 1  ;;  %s188_s6 = sand.u32 (!%p166_p9), 1, %s1046_s16  }
   0xe   : > { %169 = sbr.rel (%p166_p9) target bundleno = 1139 (0x473), region = 36  ;;  %s883_s7 = sshll.u32 (!%p166_p9), %s188_s6, 3 }
   0xf   : > { %s918_s8 = sshll.u32 (!%p166_p9), %s1103_s19, 3  ;;  %s190_s12 = scalar_lea.vmem (!%p166_p9), [#allocation2], %s883_s7 }
  0x10   : > { %s815_s11 = scalar_lea.hbm (!%p166_p9), %s1259_s4, %s918_s8  ;;  %s817_s13 = sshll.u32 (!%p166_p9), %s190_s12, 4  ;;  %s818_s13 = int_to_ptr.vmem [resolvable:$true] %s817_s13 }
  0x11   : > { %s819_s14 = sshll.u32 (!%p166_p9), %s815_s11, 4  ;;  %s805_s20 = scalar_lea.sflag (!%p166_p9), [#allocation3], %s188_s6  ;;  %s820_s14 = int_to_ptr.hbm [resolvable:$true] %s819_s14 }
  0x12   : > { %s1006_s22 = sshra.s32 (!%p166_p9), %s820_s14, 4  ;;  %s1007_s22 = int_to_ptr.hbm [resolvable:$true] %s1006_s22 }
  0x13   : > { %s192_s27 = scalar_select %p191_p10, %s1103_s19, 1  ;;  %v196_v4 = vld [vmem:[%s1256_s1] sm:$0xff]  ;;  %vm212_vm0 = vcmask 261120   ;;  %v197_v5 = vld [vmem:[%s1256_s1 + $0x8] sm:$0xff]  ;;  %v198_v6 = vld [vmem:[%s1256_s1 + $0x10] sm:$0xff]  ;;  %vm340_vm1 = vcmask 64512   ;;  %v302_v30 = vlaneseq }
  0x14   : > { %v199_v7 = vld [vmem:[%s1256_s1 + $0x18] sm:$0xff]  ;;  %v200_v8 = vld [vmem:[%s1256_s1 + $0x20] sm:$0xff]  ;;  %v202_v9 = vld [vmem:[%s1256_s1 + $0x30] sm:$0xff]  ;;  %v1056_v37 = vmov -1e+30   ;;  %s1008_s19 = scalar_lea.hbm %s1007_s22, 8  ;;  %p1013_p0 = scmp.lt.s32.totalorder %s1007_s22, %s1259_s4 }
  0x15   : > { %s921_s28 = sshll.u32 %s192_s27, 5  ;;  %v204_v10 = vld [vmem:[%s1256_s1 + $0x40] sm:$0xff]  ;;  %v201_v11 = vld [vmem:[%s1256_s1 + $0x28] sm:$0xff]  ;;  %v203_v12 = vld [vmem:[%s1256_s1 + $0x38] sm:$0xff]  ;;  %v303_v31 = vshrl.u32 %v302_v30, 7  ;;  %v305_v32 = vand.u32 127, %v302_v30  ;;  %p1009_p11 = scmp.ne.s32.totalorder %s1007_s22, %s1008_s19 }
  0x16   : > { %s195_s5 = scalar_lea.vmem %s1255_s0, %s921_s28  ;;  %v205_v17 = vld [vmem:[%s1256_s1 + $0x48] sm:$0xff]  ;;  %v206_v20 = vld [vmem:[%s1256_s1 + $0x50] sm:$0xff]  ;;  %v207_v22 = vld [vmem:[%s1256_s1 + $0x58] sm:$0xff]  ;;  %s1012_s28 = scalar_lea.hbm %s1259_s4, 16 }
  0x17   : > { %v211_v0 = vld [vmem:[%s195_s5 + $0x18] sm:$0xff]  ;;  %v210_v1 = vld [vmem:[%s195_s5 + $0x10] sm:$0xff]  ;;  %v209_v2 = vld [vmem:[%s195_s5 + $0x8] sm:$0xff]  ;;  %vm306_vm2 = vcmp.ge.s32.totalorder %v303_v31, %v305_v32  ;;  %p1010_p12 = pnand %p1009_p11, %p1120_p5  ;;  %p1014_p1 = scmp.lt.s32.totalorder %s1012_s28, %s1008_s19 }
  0x18   : > { %261 = vmatpush.msra.mxu0 %v211_v0  ;;  %922 = vmatpush.msra.mxu1 %v211_v0  ;;  %v208_v3 = vld [vmem:[%s195_s5] sm:$0xff]  ;;  %v307_v38 = vsel %vm306_vm2, 0.0, %v1056_v37  ;;  %v915_v37 = vld [vmem:[%s1257_s2 + $0x18] sm:$0xff] }
  0x19   : > { %923 = vmatpush.msra.mxu2 %v211_v0  ;;  %924 = vmatpush.msra.mxu3 %v211_v0  ;;  %v619_v53 = vld [vmem:[%s1257_s2] sm:$0xff]  ;;  %p1011_p13 = pneg %p1010_p12  ;;  %p1015_p2 = por %p1014_p1, %p1013_p0 }
  0x1a   : > { %262 = vmatpush.msra.mxu0 %v210_v1  ;;  %925 = vmatpush.msra.mxu1 %v210_v1 }
  0x1b   : > { %926 = vmatpush.msra.mxu2 %v210_v1  ;;  %927 = vmatpush.msra.mxu3 %v210_v1  ;;  %p1016_p3 = pnand %p1015_p2, %p1011_p13 }
  0x1c   : > { %263 = vmatpush.msra.mxu0 %v209_v2  ;;  %928 = vmatpush.msra.mxu1 %v209_v2 }
  0x1d   : > { %929 = vmatpush.msra.mxu2 %v209_v2  ;;  %930 = vmatpush.msra.mxu3 %v209_v2 }
  0x1e   : > { %264 = vmatpush.msra.mxu0 %v208_v3  ;;  %931 = vmatpush.msra.mxu1 %v208_v3 }
  0x1f   : > { %886 = vmatmul.msk.f32.vlgmr.msra.gmra.mxu0 %vm212_vm0, %v196_v4  ;;  %932 = vmatpush.msra.mxu2 %v208_v3 }
  0x20   : > { %933 = vmatpush.msra.mxu3 %v208_v3  ;;  %892 = vmatmul.msk.f32.vlgmr.msra.gmra.mxu1 %vm212_vm0, %v202_v9 }
  0x21   : > { %894 = vmatmul.msk.f32.vlgmr.msra.gmra.mxu2 %vm212_vm0, %v204_v10  ;;  %896 = vmatmul.msk.f32.vlgmr.msra.gmra.mxu3 %vm212_vm0, %v206_v20  ;;  %v907_v10 = vld [vmem:[%s1257_s2 + $0x8] sm:$0xff] }
  0x27   : > { %887 = vmatmul.msk.f32.gmra.mxu0 %vm212_vm0, %v197_v5 }
  0x28   : > { %893 = vmatmul.msk.f32.gmra.mxu1 %vm212_vm0, %v203_v12 }
  0x29   : > { %895 = vmatmul.msk.f32.gmra.mxu2 %vm212_vm0, %v205_v17  ;;  %897 = vmatmul.msk.f32.gmra.mxu3 %vm212_vm0, %v207_v22 }
  0x2f   : > { %888 = vmatmul.msk.f32.gmra.mxu0 %vm212_vm0, %v198_v6 }
  0x37   : > { %889 = vmatmul.msk.f32.gmra.mxu0 %vm212_vm0, %v199_v7 }
  0x3f   : > { %890 = vmatmul.msk.f32.gmra.mxu0 %vm212_vm0, %v200_v8 }
  0x47   : > { %891 = vmatmul.msk.f32.gmra.mxu0 %vm212_vm0, %v201_v11 }
  0x9c   : > { %v266_v13 = vpop.f32.mrf.mxu0 }
  0x9d   : > { %v284_v21 = vpop.f32.mrf.mxu1 }
  0x9e   : > { %469 = vmatpush.msrb.mxu3 %v284_v21 }
  0xa0   : > { %642 = vmatpush.msra.mxu3 %v619_v53 }
  0xa4   : > { %v269_v14 = vpop.f32.mrf.mxu0  ;;  %v290_v24 = vpop.f32.mrf.mxu2 }
  0xa5   : > { %364 = vxpose.xlu0.b32.start.end [1/1] (short) (narrow) %v269_v14, 8  ;;  %v287_v23 = vpop.f32.mrf.mxu1  ;;  %v296_v33 = vpop.f32.mrf.mxu3 }
  0xac   : > { %v272_v15 = vpop.f32.mrf.mxu0  ;;  %v293_v29 = vpop.f32.mrf.mxu2 }
  0xad   : > { %308 = vxpose.xlu0.b32.start.end [1/1] (short) (narrow) %v266_v13, 8  ;;  %419 = vxpose.xlu1.b32.start.end [1/1] (short) (narrow) %v272_v15, 8  ;;  %v299_v42 = vpop.f32.mrf.mxu3 }
  0xb4   : > { %v275_v16 = vpop.f32.mrf.mxu0 }
  0xb5   : > { %474 = vxpose.xlu1.b32.start.end [1/1] (short) (narrow) %v275_v16, 8 }
  0xbc   : > { %v278_v18 = vpop.f32.mrf.mxu0 }
  0xbd   : > { %359 = vmatpush.msrb.mxu1 %v278_v18 }
  0xbf   : > { %524 = vmatpush.msra.mxu1 %v287_v23 }
  0xc4   : > { %v281_v19 = vpop.f32.mrf.mxu0 }
  0xc5   : > { %414 = vmatpush.msrb.mxu2 %v281_v19 }
  0xc7   : > { %902 = vmatpush.xpose.msk.msra.mxu2 %vm340_vm1, %v290_v24 }
 0x149   : > { %v380_v25 = vpop.trf.xlu0 }
 0x14a   : > { %899 = vmatmul.msk.f32.vlgmr.msrb.gmra.mxu2 %vm340_vm1, %v380_v25 }
 0x14b   : > { %693 = vmatpush.msrb.mxu2 %v907_v10 }
 0x151   : > { %v324_v26 = vpop.trf.xlu0  ;;  %v435_v27 = vpop.trf.xlu1 }
 0x152   : > { %898 = vmatmul.msk.f32.vlgmr.msrb.gmra.mxu1 %vm340_vm1, %v324_v26  ;;  %900 = vmatmul.msk.f32.vlgmr.msrb.gmra.mxu3 %vm340_vm1, %v435_v27 }
 0x153   : > { %905 = vmatpush.xpose.msk.msrb.mxu1 %vm340_vm1, %v293_v29  ;;  %909 = vmatpush.xpose.msk.msrb.mxu3 %vm340_vm1, %v296_v33 }
 0x159   : > { %v490_v28 = vpop.trf.xlu1 }
 0x15a   : > { %901 = vmatmul.msk.f32.vlgmr.msra.gmra.mxu1 %vm340_vm1, %v490_v28 }
 0x1cd   : > { %v416_v36 = vpop.f32.mrf.mxu2 }
 0x1ce   : > { %v530_v40 = vmul.f32 0.17677669, %v416_v36 }
 0x1cf   : > { %v361_v34 = vpop.f32.mrf.mxu1 }
 0x1d0   : > { %v529_v35 = vmul.f32 0.17677669, %v361_v34  ;;  %v534_v44 = vadd.f32 %v530_v40, %v307_v38 }
 0x1d2   : > { %v533_v39 = vadd.f32 %v529_v35, %v307_v38  ;;  %v540_v46 = vsel %vm340_vm1, %v534_v44, -inf }
 0x1d4   : > { %v537_v41 = vsel %vm340_vm1, %v533_v39, -inf }
 0x1d5   : > { %538 = vmax.xlane.f32.xlu2 %v537_v41  ;;  %v471_v48 = vpop.f32.mrf.mxu3 }
 0x1d6   : > { %v531_v50 = vmul.f32 0.17677669, %v471_v48 }
 0x1d7   : > { %v526_v43 = vpop.f32.mrf.mxu1 }
 0x1d8   : > { %v532_v45 = vmul.f32 0.17677669, %v526_v43  ;;  %v535_v51 = vadd.f32 %v531_v50, %v307_v38 }
 0x1da   : > { %v536_v47 = vadd.f32 %v532_v45, %v307_v38  ;;  %v543_v52 = vsel %vm340_vm1, %v535_v51, -inf  ;;  %v911_v38 = vld [vmem:[%s1257_s2 + $0x10] sm:$0xff] }
 0x1db   : > { %745 = vmatpush.msra.mxu1 %v911_v38 }
 0x1dc   : > { %v546_v49 = vsel %vm340_vm1, %v536_v47, -inf }
 0x1dd   : > { %541 = vmax.xlane.f32.xlu2 %v540_v46 }
 0x1e5   : > { %547 = vmax.xlane.f32.xlu2 %v546_v49 }
 0x1ed   : > { %544 = vmax.xlane.f32.xlu2 %v543_v52 }
 0x248   : > { %v539_v54 = vpop.xlane.xlu2 %538 }
 0x249   : > { %v549_v55 = vsub.f32 %v533_v39, %v539_v54  ;;  %v975_v39 = vld [vmem:[%s1258_s3] ss:$0 sm:$0xff] }
 0x24b   : > { %v553_v56 = vmul.f32 1.442695, %v549_v55 }
 0x24d   : > { %976 = vpow2.f32 %v553_v56 }
 0x250   : > { %v542_v57 = vpop.xlane.xlu2 %541 }
 0x251   : > { %v550_v58 = vsub.f32 %v534_v44, %v542_v57 }
 0x253   : > { %v977_v59 = vpop.eup %976  ;;  %v555_v60 = vmul.f32 1.442695, %v550_v58 }
 0x254   : > { %v561_v61 = vsel %vm340_vm1, %v977_v59, 0.0 }
 0x255   : > { %978 = vpow2.f32 %v555_v60  ;;  %562 = vadd.xlane.f32.xlu0 %v561_v61 }
 0x258   : > { %v548_v62 = vpop.xlane.xlu2 %547 }
 0x259   : > { %v552_v63 = vsub.f32 %v536_v47, %v548_v62 }
 0x25b   : > { %v979_v0 = vpop.eup %978  ;;  %v559_v1 = vmul.f32 1.442695, %v552_v63 }
 0x25c   : > { %v564_v2 = vsel %vm340_vm1, %v979_v0, 0.0 }
 0x25d   : > { %980 = vpow2.f32 %v559_v1  ;;  %565 = vadd.xlane.f32.xlu1 %v564_v2 }
 0x260   : > { %v545_v3 = vpop.xlane.xlu2 %544 }
 0x261   : > { %v551_v4 = vsub.f32 %v535_v51, %v545_v3 }
 0x263   : > { %v981_v5 = vpop.eup %980  ;;  %v557_v6 = vmul.f32 1.442695, %v551_v4 }
 0x264   : > { %v570_v7 = vsel %vm340_vm1, %v981_v5, 0.0 }
 0x265   : > { %982 = vpow2.f32 %v557_v6  ;;  %571 = vadd.xlane.f32.xlu2 %v570_v7 }
 0x26b   : > { %v983_v8 = vpop.eup %982 }
 0x26c   : > { %v567_v9 = vsel %vm340_vm1, %v983_v8, 0.0 }
 0x26d   : > { %568 = vadd.xlane.f32.xlu2 %v567_v9 }
 0x2c8   : > { %v563_v11 = vpop.xlane.xlu0 %562 }
 0x2c9   : > { %984 = vrcp.f32 %v563_v11 }
 0x2cf   : > { %v985_v12 = vpop.eup %984 }
 0x2d0   : > { %v577_v13 = vmul.f32 %v985_v12, %v563_v11  ;;  %v566_v14 = vpop.xlane.xlu1 %565 }
 0x2d1   : > { %986 = vrcp.f32 %v566_v14 }
 0x2d2   : > { %v581_v15 = vsub.f32 2.0, %v577_v13 }
 0x2d4   : > { %v585_v16 = vmul.f32 %v985_v12, %v581_v15 }
 0x2d6   : > { %v589_v17 = vmul.f32 %v977_v59, %v585_v16 }
 0x2d7   : > { %v987_v18 = vpop.eup %986 }
 0x2d8   : > { %v578_v19 = vmul.f32 %v987_v18, %v566_v14  ;;  %903 = vmatmul.msk.f32.vlgmr.msra.gmra.mxu2 %vm340_vm1, %v589_v17  ;;  %v572_v23 = vpop.xlane.xlu2 %571 }
 0x2d9   : > { %913 = vmatpush.xpose.msk.msra.mxu2 %vm340_vm1, %v299_v42 }
 0x2da   : > { %v582_v20 = vsub.f32 2.0, %v578_v19 }
 0x2dc   : > { %v586_v21 = vmul.f32 %v987_v18, %v582_v20 }
 0x2de   : > { %v590_v22 = vmul.f32 %v979_v0, %v586_v21 }
 0x2e0   : > { %906 = vmatmul.msk.f32.vlgmr.msrb.gmra.mxu1 %vm340_vm1, %v590_v22  ;;  %v569_v24 = vpop.xlane.xlu2 %568 }
 0x2e1   : > { %988 = vrcp.f32 %v569_v24 }
 0x2e2   : > { %990 = vrcp.f32 %v572_v23 }
 0x2e7   : > { %v989_v25 = vpop.eup %988 }
 0x2e8   : > { %v991_v26 = vpop.eup %990  ;;  %v579_v27 = vmul.f32 %v989_v25, %v569_v24 }
 0x2e9   : > { %v580_v28 = vmul.f32 %v991_v26, %v572_v23 }
 0x2ea   : > { %v583_v29 = vsub.f32 2.0, %v579_v27 }
 0x2eb   : > { %v584_v31 = vsub.f32 2.0, %v580_v28 }
 0x2ec   : > { %v587_v33 = vmul.f32 %v989_v25, %v583_v29 }
 0x2ed   : > { %v588_v34 = vmul.f32 %v991_v26, %v584_v31 }
 0x2ee   : > { %v591_v35 = vmul.f32 %v983_v8, %v587_v33 }
 0x2ef   : > { %v592_v36 = vmul.f32 %v981_v5, %v588_v34 }
 0x35b   : > { %v616_v30 = vpop.f32.mrf.mxu2 }
 0x35c   : > { %904 = vmatmul.msk.f32.vlgmr.msra.gmra.mxu3 %vm340_vm1, %v616_v30 }
 0x35d   : > { %v670_v32 = vpop.f32.mrf.mxu1  ;;  %797 = vmatpush.msra.mxu3 %v915_v37 }
 0x35e   : > { %908 = vmatmul.msk.f32.vlgmr.msrb.gmra.mxu2 %vm340_vm1, %v670_v32 }
 0x364   : > { %910 = vmatmul.msk.f32.vlgmr.msrb.gmra.mxu3 %vm340_vm1, %v591_v35 }
 0x366   : > { %914 = vmatmul.msk.f32.vlgmr.msra.gmra.mxu2 %vm340_vm1, %v592_v36 }
 0x3df   : > { %v644_v40 = vpop.f32.mrf.mxu3 }
 0x3e0   : > { %v645_v41 = vadd.f32 %v975_v39, %v644_v40 }
 0x3e1   : > { %v695_v42 = vpop.f32.mrf.mxu2 }
 0x3e2   : > { %v698_v43 = vadd.f32 %v695_v42, %v645_v41 }
 0x3e7   : > { %v722_v44 = vpop.f32.mrf.mxu3 }
 0x3e8   : > { %912 = vmatmul.msk.f32.vlgmr.msra.gmra.mxu1 %vm340_vm1, %v722_v44 }
 0x3e9   : > { %v774_v45 = vpop.f32.mrf.mxu2 }
 0x3ea   : > { %916 = vmatmul.msk.f32.vlgmr.msra.gmra.mxu3 %vm340_vm1, %v774_v45 }
 0x465   : > { %v747_v46 = vpop.f32.mrf.mxu1 }
 0x466   : > { %v750_v47 = vadd.f32 %v747_v46, %v698_v43 }
 0x46d   : > { %v799_v48 = vpop.f32.mrf.mxu3 }
 0x46e   : > { %v802_v49 = vadd.f32 %v799_v48, %v750_v47 }
 0x470   : > { %803 = vst.msk [vmem:[%s190_s12] sm:$0xff] %vm212_vm0, %v802_v49 }
 0x471   : > { %1019 = shalt.err (!%p1016_p3)
}
 0x472   : > { %934 = dma.vmem_to_hbm [thread:$0]  (%p1120_p5), %s818_s13, 128, %s820_s14, %s805_s20  }
 0x473 PF: > { %p940_p4 = scmp.ge.s32.totalorder %s1054_s18, 2  ;;  %s831_s5 = sand.u32 1, %s1042_s15  }
 0x474   : > { %s832_s6 = scalar_lea.sflag [#allocation3], %s831_s5 }
 0x475   : > { %p937_p7 = pnand %p940_p4, %p1124_p6 }
 0x477   : > { %p938_p8 = pneg %p937_p7 }
 0x479   : > { %1037 = dma.done.wait (%p938_p8), %s832_s6, 128  }
 0x47a   : > { %1039 = vsyncadd (%p938_p8), %s832_s6, 4294967168  ;;  %p14_p9 = scmp.ge.s32.totalorder %s1107_s21, 4   ;;  %s1262_s15 = smov %s1046_s16 }
 0x47b   : > { %s1263_s16 = smov %s1050_s17  ;;  %s1264_s17 = smov %s1118_s24 }
 0x47c   : > { %s1265_s18 = smov %s1107_s21  ;;  %16 = sbr.rel (!%p14_p9) target bundleno = 3 (0x3), region = 74 }
 0x481   :  { %838 = vsyncpa [#allocation3], 1 }
 0x482   :  { %840 = vsyncpa [#allocation3 + $0x1], 1 }

</bundles_post_ra>
